<compile_context>
chip_gen: v5e
topology: v5e:2x2
jax: 0.10.0
libtpu: 0.0.40
codegen_flags: <defaults>
</compile_context>

<pallas_src>
import functools

import jax
import jax.numpy as jnp
from jax import lax
from jax.experimental import pallas as pl
from jax.experimental.pallas import tpu as pltpu


def _largest_divisor_at_most(n, cap):
    for d in range(min(n, cap), 0, -1):
        if n % d == 0:
            return d
    return 1


# ---------------------------------------------------------------------------
# Kernel 1: pooled gate computation (reduction over C-tiles and HW-tiles).
# ---------------------------------------------------------------------------
def _gate_kernel(x_ref, hidx_ref, widx_ref, w1_ref, b1_ref, wh_ref, bh_ref,
                 ww_ref, bw_ref, ah_ref, aw_ref, acc_ref, *, H, W):
    c, hw = pl.program_id(1), pl.program_id(2)
    first = jnp.logical_and(c == 0, hw == 0)
    last = jnp.logical_and(c == pl.num_programs(1) - 1,
                           hw == pl.num_programs(2) - 1)

    @pl.when(first)
    def _():
        acc_ref[...] = jnp.zeros_like(acc_ref)

    # Project channels first (mip << C): z = w1f @ x_tile  -> (mip, HWt).
    z = jnp.dot(w1_ref[...], x_ref[0], preferred_element_type=jnp.float32)

    # One-hot pooling selector for this lane tile, built on the (idle) VPU.
    hwt = z.shape[1]
    r = lax.broadcasted_iota(jnp.int32, (H + W, hwt), 0)
    sel = jnp.where(r < H,
                    jnp.where(hidx_ref[...] == r, 1.0, 0.0),
                    jnp.where(widx_ref[...] == r - H, 1.0, 0.0))  # (H+W, HWt)

    # acc += z @ sel^T : directional spatial sums of the channel-projected tile.
    acc_ref[...] += lax.dot_general(z, sel, (((1,), (1,)), ((), ())),
                                    preferred_element_type=jnp.float32)

    @pl.when(last)
    def _():
        y = acc_ref[...]                                        # (mip, H+W) sums
        col = lax.broadcasted_iota(jnp.int32, y.shape, 1)
        y = y * jnp.where(col < H, 1.0 / W, 1.0 / H) + b1_ref[...]   # means + folded bias
        y = y * (jnp.clip(y + 3.0, 0.0, 6.0) * (1.0 / 6.0))          # h_swish
        ah_ref[0] = jax.nn.sigmoid(
            jnp.dot(wh_ref[...], y[:, :H], preferred_element_type=jnp.float32)
            + bh_ref[...])                                      # (oup, H)
        aw_ref[0] = jax.nn.sigmoid(
            jnp.dot(ww_ref[...], y[:, H:], preferred_element_type=jnp.float32)
            + bw_ref[...])                                      # (oup, W)


# ---------------------------------------------------------------------------
# Kernel 2: broadcast the gates back onto the lane axis and apply them.
# ---------------------------------------------------------------------------
def _apply_kernel(x_ref, hidx_ref, widx_ref, ah_ref, aw_ref, o_ref, *,
                  H, W, gate_dtype):
    hidx = hidx_ref[...]                                        # (1, HWt) int32
    widx = widx_ref[...]
    hwt = hidx.shape[1]
    rh = lax.broadcasted_iota(jnp.int32, (H, hwt), 0)
    rw = lax.broadcasted_iota(jnp.int32, (W, hwt), 0)
    sel_h = jnp.where(hidx == rh, 1.0, 0.0).astype(gate_dtype)  # (H, HWt)
    sel_w = jnp.where(widx == rw, 1.0, 0.0).astype(gate_dtype)  # (W, HWt)
    ah_full = jnp.dot(ah_ref[0].astype(gate_dtype), sel_h,
                      preferred_element_type=jnp.float32)       # (Ct, HWt)
    aw_full = jnp.dot(aw_ref[0].astype(gate_dtype), sel_w,
                      preferred_element_type=jnp.float32)       # (Ct, HWt)
    # out = identity * a_w * a_h (same multiply order as the PyTorch module).
    o_ref[0] = ((x_ref[0] * aw_full) * ah_full).astype(o_ref.dtype)


# ---------------------------------------------------------------------------
# Wrapper.
# ---------------------------------------------------------------------------
def coord_att(x, params, *, c_tile=128, hw_tile=2048, gate_dtype=jnp.float32):
    """x: (N, C, H, W) float32. params: dict of weights (see init_params)."""
    N, C, H, W = x.shape
    HW = H * W
    w1 = params["w1"]
    mip = w1.shape[0]
    oup = params["wh"].shape[0]
    assert oup == C, "CoordAtt gating requires oup == C"

    # Fold eval-mode BatchNorm and the conv1 bias into one weight/bias.
    # TODO(synk): training-mode BatchNorm (batch statistics + running-stat
    # update) is not implemented; eval-mode running stats are assumed.
    eps = 1e-5
    bn_scale = params["bn_gamma"] / jnp.sqrt(params["bn_var"] + eps)
    bn_shift = params["bn_beta"] - params["bn_mean"] * bn_scale
    w1f = (bn_scale[:, None] * w1).astype(jnp.float32)                  # (mip, C)
    b1f = (bn_scale * params["b1"] + bn_shift).reshape(mip, 1).astype(jnp.float32)
    wh = params["wh"].astype(jnp.float32)
    ww = params["ww"].astype(jnp.float32)
    bh = params["bh"].reshape(oup, 1).astype(jnp.float32)
    bw = params["bw"].reshape(oup, 1).astype(jnp.float32)

    # Pad the flattened spatial axis to a lane-dense multiple of 128.
    HWp = ((HW + 127) // 128) * 128
    x_flat = x.reshape(N, C, HW).astype(jnp.float32)
    if HWp != HW:
        x_flat = jnp.pad(x_flat, ((0, 0), (0, 0), (0, HWp - HW)))
    pos = jnp.arange(HWp, dtype=jnp.int32)
    valid = pos < HW
    hidx = jnp.where(valid, pos // W, -1).astype(jnp.int32).reshape(1, HWp)
    widx = jnp.where(valid, pos % W, -1).astype(jnp.int32).reshape(1, HWp)

    # Tile sizes: lane tile (multiple of 128 dividing HWp), channel tile
    # (multiple of 8 dividing C when C is tiled).
    HWt = 128 * _largest_divisor_at_most(HWp // 128, max(1, hw_tile // 128))
    if C % 8 == 0 and C > c_tile:
        Ct = 8 * _largest_divisor_at_most(C // 8, max(1, c_tile // 8))
    else:
        Ct = C
    C_r, HW_r = C // Ct, HWp // HWt

    # VMEM budgets derived from the actual tile sizes (+ headroom), capped well
    # above need but never forced down to a 32 MiB clamp.
    def _vmem(nbytes):
        return int(min(max(nbytes + (2 << 20), 4 << 20), 100 << 20))

    gate_vmem = _vmem(
        2 * Ct * HWt * 4                 # x tiles (double-buffered)
        + 2 * 2 * HWt * 4                # hidx / widx tiles
        + 2 * mip * Ct * 4               # w1 tile
        + 2 * (mip + 2 * oup * mip + 2 * oup) * 4   # small constants
        + mip * (H + W) * 4              # pooled accumulator scratch
        + (mip + H + W) * HWt * 4        # z / selector temporaries
        + 2 * 2 * oup * (H + W) * 4)     # gate output blocks
    gsize = jnp.dtype(gate_dtype).itemsize
    apply_vmem = _vmem(
        4 * Ct * HWt * 4                 # x + out tiles (double-buffered)
        + 2 * 2 * HWt * 4                # hidx / widx tiles
        + 4 * Ct * (H + W) * 4           # a_h / a_w tiles
        + (H + W) * HWt * gsize          # selector temporaries
        + 2 * Ct * HWt * 4)              # broadcast-back gate temporaries

    def full(shape):
        return pl.BlockSpec(shape, lambda n, c, k: (0,) * len(shape))

    # --- call 1: gates ------------------------------------------------------
    gate_kernel = functools.partial(_gate_kernel, H=H, W=W)
    a_h, a_w = pl.pallas_call(
        gate_kernel,
        out_shape=(jax.ShapeDtypeStruct((N, oup, H), jnp.float32),
                   jax.ShapeDtypeStruct((N, oup, W), jnp.float32)),
        grid_spec=pltpu.PrefetchScalarGridSpec(
            num_scalar_prefetch=0,
            grid=(N, C_r, HW_r),
            in_specs=[
                pl.BlockSpec((1, Ct, HWt), lambda n, c, k: (n, c, k)),   # x
                pl.BlockSpec((1, HWt), lambda n, c, k: (0, k)),          # hidx
                pl.BlockSpec((1, HWt), lambda n, c, k: (0, k)),          # widx
                pl.BlockSpec((mip, Ct), lambda n, c, k: (0, c)),         # w1 (BN folded)
                full((mip, 1)),                                          # b1 (BN folded)
                full((oup, mip)),                                        # conv_h weight
                full((oup, 1)),                                          # conv_h bias
                full((oup, mip)),                                        # conv_w weight
                full((oup, 1)),                                          # conv_w bias
            ],
            out_specs=[pl.BlockSpec((1, oup, H), lambda n, c, k: (n, 0, 0)),
                       pl.BlockSpec((1, oup, W), lambda n, c, k: (n, 0, 0))],
            scratch_shapes=[pltpu.VMEM((mip, H + W), jnp.float32)],
        ),
        compiler_params=pltpu.CompilerParams(
            dimension_semantics=("parallel", "arbitrary", "arbitrary"),
            vmem_limit_bytes=gate_vmem),
    )(x_flat, hidx, widx, w1f, b1f, wh, bh, ww, bw)

    # --- call 2: apply the gates (fully parallel, lane-dense tiles) ----------
    apply_kernel = functools.partial(_apply_kernel, H=H, W=W,
                                     gate_dtype=gate_dtype)
    out = pl.pallas_call(
        apply_kernel,
        out_shape=jax.ShapeDtypeStruct((N, C, HWp), jnp.float32),
        grid_spec=pltpu.PrefetchScalarGridSpec(
            num_scalar_prefetch=0,
            grid=(N, C_r, HW_r),
            in_specs=[
                pl.BlockSpec((1, Ct, HWt), lambda n, c, k: (n, c, k)),   # x
                pl.BlockSpec((1, HWt), lambda n, c, k: (0, k)),          # hidx
                pl.BlockSpec((1, HWt), lambda n, c, k: (0, k)),          # widx
                pl.BlockSpec((1, Ct, H), lambda n, c, k: (n, c, 0)),     # a_h
                pl.BlockSpec((1, Ct, W), lambda n, c, k: (n, c, 0)),     # a_w
            ],
            out_specs=pl.BlockSpec((1, Ct, HWt), lambda n, c, k: (n, c, k)),
        ),
        compiler_params=pltpu.CompilerParams(
            dimension_semantics=("parallel", "parallel", "parallel"),
            vmem_limit_bytes=apply_vmem),
    )(x_flat, hidx, widx, a_h, a_w)

    return out[:, :, :HW].reshape(N, C, H, W)


# ---------------------------------------------------------------------------
# Parameters and pure-JAX reference (mirrors the PyTorch forward, eval-mode BN).
# ---------------------------------------------------------------------------
def init_params(key, inp, oup, reduction=32):
    mip = max(8, inp // reduction)
    ks = jax.random.split(key, 6)
    return {
        "w1": jax.random.normal(ks[0], (mip, inp), jnp.float32) * 0.2,
        "b1": jax.random.normal(ks[1], (mip,), jnp.float32) * 0.1,
        "bn_gamma": jnp.ones((mip,), jnp.float32) * 1.1,
        "bn_beta": jnp.ones((mip,), jnp.float32) * 0.05,
        "bn_mean": jnp.zeros((mip,), jnp.float32),
        "bn_var": jnp.ones((mip,), jnp.float32),
        "wh": jax.random.normal(ks[2], (oup, mip), jnp.float32) * 0.2,
        "bh": jax.random.normal(ks[3], (oup,), jnp.float32) * 0.1,
        "ww": jax.random.normal(ks[4], (oup, mip), jnp.float32) * 0.2,
        "bw": jax.random.normal(ks[5], (oup,), jnp.float32) * 0.1,
    }


def coord_att_ref(x, params):
    N, C, H, W = x.shape
    eps = 1e-5
    x_h = jnp.mean(x, axis=3)                          # (N, C, H)
    x_w = jnp.mean(x, axis=2)                          # (N, C, W)
    y = jnp.concatenate([x_h, x_w], axis=2)            # (N, C, H+W)
    y = jnp.einsum("mc,ncl->nml", params["w1"], y) + params["b1"][None, :, None]
    scale = params["bn_gamma"] / jnp.sqrt(params["bn_var"] + eps)
    shift = params["bn_beta"] - params["bn_mean"] * scale
    y = y * scale[None, :, None] + shift[None, :, None]
    y = y * (jnp.clip(y + 3.0, 0.0, 6.0) / 6.0)
    yh, yw = y[:, :, :H], y[:, :, H:]
    a_h = jax.nn.sigmoid(jnp.einsum("om,nml->nol", params["wh"], yh)
                         + params["bh"][None, :, None])
    a_w = jax.nn.sigmoid(jnp.einsum("om,nml->nol", params["ww"], yw)
                         + params["bw"][None, :, None])
    return x * a_w[:, :, None, :] * a_h[:, :, :, None]


def _run_case(key, N, C, H, W, reduction=32, tol=2e-5):
    kx, kp = jax.random.split(key)
    x = jax.random.normal(kx, (N, C, H, W), jnp.float32)
    params = init_params(kp, C, C, reduction=reduction)
    out = jax.block_until_ready(coord_att(x, params))
    ref = coord_att_ref(x, params)
    assert out.shape == (N, C, H, W)
    err = float(jnp.max(jnp.abs(out - ref)))
    assert bool(jnp.allclose(out, ref, atol=tol, rtol=tol)), (
        f"mismatch vs reference (max abs err {err}) at shape {(N, C, H, W)}")


if __name__ == "__main__":
    root = jax.random.PRNGKey(0)
    k0, k1, k2 = jax.random.split(root, 3)
    _run_case(k0, 2, 4, 16, 16)     # base demo shape (HW already lane-dense)
    _run_case(k1, 2, 16, 12, 12)    # exercises HW padding (144 -> 256 lanes)
    _run_case(k2, 2, 256, 8, 8)     # exercises channel tiling (C_r = 2)
    print("KERNEL_OK")
</pallas_src>

<mosaic_0001>
module attributes {stable_mosaic.version = 11 : i64} {
  func.func @_gate_kernel(%arg0: i32, %arg1: i32, %arg2: i32, %arg3: memref<1x4x256xf32, #tpu.memory_space<vmem>>, %arg4: memref<1x256xi32, #tpu.memory_space<vmem>>, %arg5: memref<1x256xi32, #tpu.memory_space<vmem>>, %arg6: memref<8x4xf32, #tpu.memory_space<vmem>>, %arg7: memref<8x1xf32, #tpu.memory_space<vmem>>, %arg8: memref<4x8xf32, #tpu.memory_space<vmem>>, %arg9: memref<4x1xf32, #tpu.memory_space<vmem>>, %arg10: memref<4x8xf32, #tpu.memory_space<vmem>>, %arg11: memref<4x1xf32, #tpu.memory_space<vmem>>, %arg12: memref<1x4x16xf32, #tpu.memory_space<vmem>>, %arg13: memref<1x4x16xf32, #tpu.memory_space<vmem>>, %arg14: memref<8x32xf32, #tpu.memory_space<vmem>>) attributes {dimension_semantics = [#tpu.dimension_semantics<parallel>, #tpu.dimension_semantics<arbitrary>, #tpu.dimension_semantics<arbitrary>], iteration_bounds = array<i64: 2, 1, 1>, scalar_prefetch = 0 : i64, scratch_operands = 1 : i64, tpu.core_type = #tpu.core_type<tc>, window_params = [{transform_indices = @transform_0, window_bounds = array<i64: 1, 4, 256>}, {transform_indices = @transform_1, window_bounds = array<i64: 1, 256>}, {transform_indices = @transform_2, window_bounds = array<i64: 1, 256>}, {transform_indices = @transform_3, window_bounds = array<i64: 8, 4>}, {pipeline_mode = #tpu.pipeline_mode<synchronous>, transform_indices = @transform_4, window_bounds = array<i64: 8, 1>}, {pipeline_mode = #tpu.pipeline_mode<synchronous>, transform_indices = @transform_5, window_bounds = array<i64: 4, 8>}, {pipeline_mode = #tpu.pipeline_mode<synchronous>, transform_indices = @transform_6, window_bounds = array<i64: 4, 1>}, {pipeline_mode = #tpu.pipeline_mode<synchronous>, transform_indices = @transform_7, window_bounds = array<i64: 4, 8>}, {pipeline_mode = #tpu.pipeline_mode<synchronous>, transform_indices = @transform_8, window_bounds = array<i64: 4, 1>}, {transform_indices = @transform_9, window_bounds = array<i64: 1, 4, 16>}, {transform_indices = @transform_10, window_bounds = array<i64: 1, 4, 16>}]} {
    %c0_i32 = arith.constant 0 : i32
    %0 = arith.cmpi eq, %arg1, %c0_i32 : i32
    %c0_i32_0 = arith.constant 0 : i32
    %1 = arith.cmpi eq, %arg2, %c0_i32_0 : i32
    %2 = arith.andi %0, %1 : i1
    %c0_i32_1 = arith.constant 0 : i32
    %3 = arith.cmpi eq, %arg1, %c0_i32_1 : i32
    %c0_i32_2 = arith.constant 0 : i32
    %4 = arith.cmpi eq, %arg2, %c0_i32_2 : i32
    %5 = arith.andi %3, %4 : i1
    %6 = arith.extui %2 : i1 to i32
    %c0_i32_3 = arith.constant 0 : i32
    %7 = arith.cmpi ne, %6, %c0_i32_3 : i32
    scf.if %7 {
      %cst_23 = arith.constant 0.000000e+00 : f32
      %36 = vector.broadcast %cst_23 : f32 to vector<8x32xf32>
      %c0_24 = arith.constant 0 : index
      %c0_25 = arith.constant 0 : index
      %37 = vector.load %arg14[%c0_24, %c0_25] : memref<8x32xf32, #tpu.memory_space<vmem>>, vector<8x32xf32>
      tpu.vector_store %arg14[%c0_24, %c0_25], %36 {strides = array<i32>} : memref<8x32xf32, #tpu.memory_space<vmem>>, vector<8x32xf32>,
    } else {
    }
    %c0 = arith.constant 0 : index
    %c0_4 = arith.constant 0 : index
    %8 = vector.load %arg6[%c0, %c0_4] : memref<8x4xf32, #tpu.memory_space<vmem>>, vector<8x4xf32>
    %c0_5 = arith.constant 0 : index
    %c0_6 = arith.constant 0 : index
    %c0_7 = arith.constant 0 : index
    %9 = vector.load %arg3[%c0_5, %c0_6, %c0_7] : memref<1x4x256xf32, #tpu.memory_space<vmem>>, vector<1x4x256xf32>
    %10 = vector.shape_cast %9 : vector<1x4x256xf32> to vector<4x256xf32>
    %cst = arith.constant dense<0.000000e+00> : vector<8x256xf32>
    %11 = tpu.matmul %8, %10, %cst {dimension_numbers = #tpu.dot_dimension_numbers<[1], [0], [0], [1], [0, 0, 1, 1], [], []>} : vector<8x4xf32>, vector<4x256xf32>, vector<8x256xf32> -> vector<8x256xf32>
    %12 = tpu.iota {dimensions = array<i32: 0>} : vector<32x256xi32>
    %c16_i32 = arith.constant 16 : i32
    %13 = vector.broadcast %c16_i32 : i32 to vector<32x256xi32>
    %14 = arith.cmpi slt, %12, %13 : vector<32x256xi32>
    %c0_8 = arith.constant 0 : index
    %c0_9 = arith.constant 0 : index
    %15 = vector.load %arg4[%c0_8, %c0_9] : memref<1x256xi32, #tpu.memory_space<vmem>>, vector<1x256xi32>
    %16 = vector.broadcast %15 : vector<1x256xi32> to vector<32x256xi32>
    %17 = arith.cmpi eq, %16, %12 : vector<32x256xi32>
    %cst_10 = arith.constant 1.000000e+00 : f32
    %cst_11 = arith.constant 0.000000e+00 : f32
    %18 = vector.broadcast %cst_10 : f32 to vector<32x256xf32>
    %19 = vector.broadcast %cst_11 : f32 to vector<32x256xf32>
    %20 = arith.select %17, %18, %19 : vector<32x256xi1>, vector<32x256xf32>
    %c0_12 = arith.constant 0 : index
    %c0_13 = arith.constant 0 : index
    %21 = vector.load %arg5[%c0_12, %c0_13] : memref<1x256xi32, #tpu.memory_space<vmem>>, vector<1x256xi32>
    %c16_i32_14 = arith.constant 16 : i32
    %22 = vector.broadcast %c16_i32_14 : i32 to vector<32x256xi32>
    %23 = arith.subi %12, %22 : vector<32x256xi32>
    %24 = vector.broadcast %21 : vector<1x256xi32> to vector<32x256xi32>
    %25 = arith.cmpi eq, %24, %23 : vector<32x256xi32>
    %cst_15 = arith.constant 1.000000e+00 : f32
    %cst_16 = arith.constant 0.000000e+00 : f32
    %26 = vector.broadcast %cst_15 : f32 to vector<32x256xf32>
    %27 = vector.broadcast %cst_16 : f32 to vector<32x256xf32>
    %28 = arith.select %25, %26, %27 : vector<32x256xi1>, vector<32x256xf32>
    %29 = arith.select %14, %20, %28 : vector<32x256xi1>, vector<32x256xf32>
    %c0_17 = arith.constant 0 : index
    %c0_18 = arith.constant 0 : index
    %30 = vector.load %arg14[%c0_17, %c0_18] : memref<8x32xf32, #tpu.memory_space<vmem>>, vector<8x32xf32>
    %cst_19 = arith.constant dense<0.000000e+00> : vector<8x32xf32>
    %31 = tpu.matmul %11, %29, %cst_19 {dimension_numbers = #tpu.dot_dimension_numbers<[1], [1], [0], [0], [0, 0, 1, 0], [], []>} : vector<8x256xf32>, vector<32x256xf32>, vector<8x32xf32> -> vector<8x32xf32>
    %32 = arith.addf %30, %31 : vector<8x32xf32>
    %c0_20 = arith.constant 0 : index
    %c0_21 = arith.constant 0 : index
    %33 = vector.load %arg14[%c0_20, %c0_21] : memref<8x32xf32, #tpu.memory_space<vmem>>, vector<8x32xf32>
    tpu.vector_store %arg14[%c0_20, %c0_21], %32 {strides = array<i32>} : memref<8x32xf32, #tpu.memory_space<vmem>>, vector<8x32xf32>,
    %34 = arith.extui %5 : i1 to i32
    %c0_i32_22 = arith.constant 0 : i32
    %35 = arith.cmpi ne, %34, %c0_i32_22 : i32
    scf.if %35 {
      %c0_23 = arith.constant 0 : index
      %c0_24 = arith.constant 0 : index
      %36 = vector.load %arg14[%c0_23, %c0_24] : memref<8x32xf32, #tpu.memory_space<vmem>>, vector<8x32xf32>
      %37 = tpu.iota {dimensions = array<i32: 1>} : vector<8x32xi32>
      %c16_i32_25 = arith.constant 16 : i32
      %38 = vector.broadcast %c16_i32_25 : i32 to vector<8x32xi32>
      %39 = arith.cmpi slt, %37, %38 : vector<8x32xi32>
      %cst_26 = arith.constant 6.250000e-02 : f32
      %cst_27 = arith.constant 6.250000e-02 : f32
      %40 = vector.broadcast %cst_26 : f32 to vector<8x32xf32>
      %41 = vector.broadcast %cst_27 : f32 to vector<8x32xf32>
      %42 = arith.select %39, %40, %41 : vector<8x32xi1>, vector<8x32xf32>
      %43 = arith.mulf %36, %42 : vector<8x32xf32>
      %c0_28 = arith.constant 0 : index
      %c0_29 = arith.constant 0 : index
      %44 = vector.load %arg7[%c0_28, %c0_29] : memref<8x1xf32, #tpu.memory_space<vmem>>, vector<8x1xf32>
      %45 = vector.broadcast %44 : vector<8x1xf32> to vector<8x32xf32>
      %46 = arith.addf %43, %45 : vector<8x32xf32>
      %cst_30 = arith.constant 3.000000e+00 : f32
      %47 = vector.broadcast %cst_30 : f32 to vector<8x32xf32>
      %48 = arith.addf %46, %47 : vector<8x32xf32>
      %cst_31 = arith.constant 0.000000e+00 : f32
      %cst_32 = arith.constant 6.000000e+00 : f32
      %49 = vector.broadcast %cst_31 : f32 to vector<8x32xf32>
      %50 = arith.maximumf %49, %48 : vector<8x32xf32>
      %51 = vector.broadcast %cst_32 : f32 to vector<8x32xf32>
      %52 = arith.minimumf %51, %50 : vector<8x32xf32>
      %cst_33 = arith.constant 0.166666672 : f32
      %53 = vector.broadcast %cst_33 : f32 to vector<8x32xf32>
      %54 = arith.mulf %52, %53 : vector<8x32xf32>
      %55 = arith.mulf %46, %54 : vector<8x32xf32>
      %c0_34 = arith.constant 0 : index
      %c0_35 = arith.constant 0 : index
      %56 = vector.load %arg8[%c0_34, %c0_35] : memref<4x8xf32, #tpu.memory_space<vmem>>, vector<4x8xf32>
      %57 = vector.extract_strided_slice %55 {offsets = [0, 0], sizes = [8, 16], strides = [1, 1]} : vector<8x32xf32> to vector<8x16xf32>
      %cst_36 = arith.constant dense<0.000000e+00> : vector<4x16xf32>
      %58 = tpu.matmul %56, %57, %cst_36 {dimension_numbers = #tpu.dot_dimension_numbers<[1], [0], [0], [1], [0, 0, 1, 1], [], []>} : vector<4x8xf32>, vector<8x16xf32>, vector<4x16xf32> -> vector<4x16xf32>
      %c0_37 = arith.constant 0 : index
      %c0_38 = arith.constant 0 : index
      %59 = vector.load %arg9[%c0_37, %c0_38] : memref<4x1xf32, #tpu.memory_space<vmem>>, vector<4x1xf32>
      %60 = vector.broadcast %59 : vector<4x1xf32> to vector<4x16xf32>
      %61 = arith.addf %58, %60 : vector<4x16xf32>
      %62 = arith.negf %61 : vector<4x16xf32>
      %63 = math.exp %62 : vector<4x16xf32>
      %cst_39 = arith.constant 1.000000e+00 : f32
      %64 = vector.broadcast %cst_39 : f32 to vector<4x16xf32>
      %65 = arith.addf %64, %63 : vector<4x16xf32>
      %66 = arith.divf %64, %65 : vector<4x16xf32>
      %c0_40 = arith.constant 0 : index
      %c0_41 = arith.constant 0 : index
      %c0_42 = arith.constant 0 : index
      %67 = vector.load %arg12[%c0_40, %c0_41, %c0_42] : memref<1x4x16xf32, #tpu.memory_space<vmem>>, vector<1x4x16xf32>
      %68 = vector.shape_cast %67 : vector<1x4x16xf32> to vector<4x16xf32>
      %69 = vector.shape_cast %66 : vector<4x16xf32> to vector<1x4x16xf32>
      tpu.vector_store %arg12[%c0_40, %c0_41, %c0_42], %69 {strides = array<i32>} : memref<1x4x16xf32, #tpu.memory_space<vmem>>, vector<1x4x16xf32>,
      %c0_43 = arith.constant 0 : index
      %c0_44 = arith.constant 0 : index
      %70 = vector.load %arg10[%c0_43, %c0_44] : memref<4x8xf32, #tpu.memory_space<vmem>>, vector<4x8xf32>
      %71 = vector.extract_strided_slice %55 {offsets = [0, 16], sizes = [8, 16], strides = [1, 1]} : vector<8x32xf32> to vector<8x16xf32>
      %cst_45 = arith.constant dense<0.000000e+00> : vector<4x16xf32>
      %72 = tpu.matmul %70, %71, %cst_45 {dimension_numbers = #tpu.dot_dimension_numbers<[1], [0], [0], [1], [0, 0, 1, 1], [], []>} : vector<4x8xf32>, vector<8x16xf32>, vector<4x16xf32> -> vector<4x16xf32>
      %c0_46 = arith.constant 0 : index
      %c0_47 = arith.constant 0 : index
      %73 = vector.load %arg11[%c0_46, %c0_47] : memref<4x1xf32, #tpu.memory_space<vmem>>, vector<4x1xf32>
      %74 = vector.broadcast %73 : vector<4x1xf32> to vector<4x16xf32>
      %75 = arith.addf %72, %74 : vector<4x16xf32>
      %76 = arith.negf %75 : vector<4x16xf32>
      %77 = math.exp %76 : vector<4x16xf32>
      %cst_48 = arith.constant 1.000000e+00 : f32
      %78 = vector.broadcast %cst_48 : f32 to vector<4x16xf32>
      %79 = arith.addf %78, %77 : vector<4x16xf32>
      %80 = arith.divf %78, %79 : vector<4x16xf32>
      %c0_49 = arith.constant 0 : index
      %c0_50 = arith.constant 0 : index
      %c0_51 = arith.constant 0 : index
      %81 = vector.load %arg13[%c0_49, %c0_50, %c0_51] : memref<1x4x16xf32, #tpu.memory_space<vmem>>, vector<1x4x16xf32>
      %82 = vector.shape_cast %81 : vector<1x4x16xf32> to vector<4x16xf32>
      %83 = vector.shape_cast %80 : vector<4x16xf32> to vector<1x4x16xf32>
      tpu.vector_store %arg13[%c0_49, %c0_50, %c0_51], %83 {strides = array<i32>} : memref<1x4x16xf32, #tpu.memory_space<vmem>>, vector<1x4x16xf32>,
    } else {
    }
    return
  }
  func.func @transform_0(%arg0: i32, %arg1: i32, %arg2: i32) -> (i32, i32, i32) {
    %c0_i32 = arith.constant 0 : i32
    return %arg0, %arg1, %arg2 : i32, i32, i32
  }
  func.func @transform_1(%arg0: i32, %arg1: i32, %arg2: i32) -> (i32, i32) {
    %c0_i32 = arith.constant 0 : i32
    %c0_i32_0 = arith.constant 0 : i32
    return %c0_i32, %arg2 : i32, i32
  }
  func.func @transform_2(%arg0: i32, %arg1: i32, %arg2: i32) -> (i32, i32) {
    %c0_i32 = arith.constant 0 : i32
    %c0_i32_0 = arith.constant 0 : i32
    return %c0_i32, %arg2 : i32, i32
  }
  func.func @transform_3(%arg0: i32, %arg1: i32, %arg2: i32) -> (i32, i32) {
    %c0_i32 = arith.constant 0 : i32
    %c0_i32_0 = arith.constant 0 : i32
    return %c0_i32, %arg1 : i32, i32
  }
  func.func @transform_4(%arg0: i32, %arg1: i32, %arg2: i32) -> (i32, i32) {
    %c0_i32 = arith.constant 0 : i32
    %c0_i32_0 = arith.constant 0 : i32
    %c0_i32_1 = arith.constant 0 : i32
    return %c0_i32, %c0_i32_0 : i32, i32
  }
  func.func @transform_5(%arg0: i32, %arg1: i32, %arg2: i32) -> (i32, i32) {
    %c0_i32 = arith.constant 0 : i32
    %c0_i32_0 = arith.constant 0 : i32
    %c0_i32_1 = arith.constant 0 : i32
    return %c0_i32, %c0_i32_0 : i32, i32
  }
  func.func @transform_6(%arg0: i32, %arg1: i32, %arg2: i32) -> (i32, i32) {
    %c0_i32 = arith.constant 0 : i32
    %c0_i32_0 = arith.constant 0 : i32
    %c0_i32_1 = arith.constant 0 : i32
    return %c0_i32, %c0_i32_0 : i32, i32
  }
  func.func @transform_7(%arg0: i32, %arg1: i32, %arg2: i32) -> (i32, i32) {
    %c0_i32 = arith.constant 0 : i32
    %c0_i32_0 = arith.constant 0 : i32
    %c0_i32_1 = arith.constant 0 : i32
    return %c0_i32, %c0_i32_0 : i32, i32
  }
  func.func @transform_8(%arg0: i32, %arg1: i32, %arg2: i32) -> (i32, i32) {
    %c0_i32 = arith.constant 0 : i32
    %c0_i32_0 = arith.constant 0 : i32
    %c0_i32_1 = arith.constant 0 : i32
    return %c0_i32, %c0_i32_0 : i32, i32
  }
  func.func @transform_9(%arg0: i32, %arg1: i32, %arg2: i32) -> (i32, i32, i32) {
    %c0_i32 = arith.constant 0 : i32
    %c0_i32_0 = arith.constant 0 : i32
    %c0_i32_1 = arith.constant 0 : i32
    return %arg0, %c0_i32, %c0_i32_0 : i32, i32, i32
  }
  func.func @transform_10(%arg0: i32, %arg1: i32, %arg2: i32) -> (i32, i32, i32) {
    %c0_i32 = arith.constant 0 : i32
    %c0_i32_0 = arith.constant 0 : i32
    %c0_i32_1 = arith.constant 0 : i32
    return %arg0, %c0_i32, %c0_i32_0 : i32, i32, i32
  }
}

</mosaic_0001>

<bundles_post_ra>
// kernel: tpu_custom_call.1
= control target key start
LH: loop header
LB: loop body
LE: loop exit
PB: predicated region body
PF: predicated region fallthrough
CT: control target
= control target key end

     0   :  { %16 = vsyncpa [#allocation4], 0  ;;  %s1506_s0 = inlined_call_operand.vmem [shape: f32[2,4,256], index: 0, kind: input, shape index: {}]   ;;  %s1507_s1 = inlined_call_operand.hbm [shape: s32[1,256], index: 1, kind: input, shape index: {}]   ;;  %s1508_s2 = inlined_call_operand.hbm [shape: s32[1,256], index: 2, kind: input, shape index: {}]   ;;  %s1509_s3 = inlined_call_operand.vmem [shape: f32[8,4], index: 3, kind: input, shape index: {}]   ;;  %s1510_s4 = inlined_call_operand.vmem [shape: f32[8,1], index: 4, kind: input, shape index: {}]   ;;  %s1511_s5 = inlined_call_operand.vmem [shape: f32[4,8], index: 5, kind: input, shape index: {}]   ;;  %s1512_s6 = inlined_call_operand.vmem [shape: f32[4,1], index: 6, kind: input, shape index: {}]   ;;  %s1513_s7 = inlined_call_operand.vmem [shape: f32[4,8], index: 7, kind: input, shape index: {}]   ;;  %s1514_s8 = inlined_call_operand.vmem [shape: f32[4,1], index: 8, kind: input, shape index: {}]   ;;  %s1515_s9 = inlined_call_operand.hbm [shape: f32[2,4,16], index: 9, kind: output, shape index: {0}]   ;;  %s1516_s10 = inlined_call_operand.hbm [shape: f32[2,4,16], index: 10, kind: output, shape index: {1}]  }
   0x1   :  { %17 = vsyncpa [#allocation7], 0 }
   0x2   :  { %18 = vsyncpa [#allocation5], 0 }
   0x3   :  { %20 = vsyncpa [#allocation5 + $0x1], 0 }
   0x4   :  { %21 = vsyncpa [#allocation10], 0 }
   0x5   :  { %23 = vsyncpa [#allocation10 + $0x1], 0  ;;  %s1335_s13 = smov 0   ;;  %s1337_s14 = smov 0  }
   0x6   :  { %s1339_s15 = smov 0   ;;  %s1341_s16 = smov 0  }
   0x7   :  { %s1343_s17 = smov 0   ;;  %s1345_s18 = smov 0  }
   0x8 LB: > { %1521 = sst [smem:[#allocation15_spill]] %s1268_s17  ;;  %s959_s19 = sadd.s32 4294967295, %s1272_s18   ;;  %s1272_s18 = sphi %s1345_s18, %s29_s18   ;;  %s1268_s17 = sphi %s1343_s17, %s1530_s17   ;;  %s1264_s16 = sphi %s1341_s16, %s1529_s16   ;;  %s1260_s15 = sphi %s1339_s15, %s1533_s15   ;;  %s1256_s14 = sphi %s1337_s14, %s1532_s14   ;;  %s1252_s13 = sphi %s1335_s13, %s1531_s13  }
   0x9   : > { %s960_s20 = sadd.s32 4294967294, %s1272_s18   ;;  %s48_s21 = sadd.s32 1, %s1268_s17 }
   0xa   : > { %s268_s22 = sadd.s32 1, %s1260_s15  ;;  %p50_p0 = scmp.ge.s32.totalorder %s48_s21, 2 }
   0xb   : > { %p278_p1 = scmp.ne.s32.totalorder %s1260_s15, %s1256_s14  ;;  %p279_p2 = scmp.eq.s32.totalorder %s959_s19, 1 }
   0xc   : > { %p284_p3 = scmp.ne.s32.totalorder %s1256_s14, %s1252_s13  ;;  %s1535_s21 = smov (%p50_p0, %s48_s21), 0 }
   0xd   : > { %1522 = sst [smem:[#allocation16_spill]] %s1535_s21  ;;  %p1375_p4 = por %p279_p2, %p278_p1 }
   0xe   : > { %p285_p5 = scmp.eq.s32.totalorder %s960_s20, 1  ;;  %s265_s24 = ssub.s32 %s1268_s17, %s1535_s21 }
   0xf   : > { %p961_p6 = scmp.ge.s32.totalorder %s1272_s18, 1  ;;  %p266_p7 = scmp.eq.s32.totalorder %s265_s24, 0 }
  0x10   : > { %p1382_p8 = por %p285_p5, %p284_p3  ;;  %p318_p9 = scmp.lt.s32.totalorder %s1272_s18, 3 }
  0x11   : > { %s1388_s26 = scalar_select %p266_p7, %s1260_s15, %s268_s22  }
  0x12   : > { %p1390_p10 = pnand %p961_p6, %p318_p9  ;;  %p1394_p11 = scmp.eq.s32.totalorder %s959_s19, 0 }
  0x13   : > { %s332_s11 = sshll.u32 %s1507_s1, 4  ;;  %s1274_s12 = smov [#allocation3]   ;;  %s333_s11 = int_to_ptr.hbm [resolvable:$true] %s332_s11 }
  0x14   : > { %p1011_p12 = pneg %p1390_p10  ;;  %s334_s20 = sshll.u32 %s1274_s12, 4  ;;  %s335_s20 = int_to_ptr.vmem [resolvable:$true] %s334_s20 }
  0x15   : > { %s346_s21 = sshll.u32 %s1508_s2, 4  ;;  %s1275_s19 = smov [#allocation6]   ;;  %s347_s21 = int_to_ptr.hbm [resolvable:$true] %s346_s21 }
  0x16   : > { %p1012_p13 = pnand %p1394_p11, %p1011_p12  ;;  %s348_s17 = sshll.u32 %s1275_s19, 4  ;;  %s349_s17 = int_to_ptr.vmem [resolvable:$true] %s348_s17 }
  0x17   : > { %400 = sbr.rel (%p1390_p10) target bundleno = 606 (0x25e), region = 56 }
  0x18   : > { %1014 = dma.hbm_to_vmem [thread:$0]  (!%p1012_p13), %s333_s11, 32, %s335_s20, [#allocation4]  }
  0x19   : > { %1017 = dma.hbm_to_vmem [thread:$0]  (!%p1012_p13), %s347_s21, 32, %s349_s17, [#allocation7]  }
  0x1c   : > { %1235 = dma.done.wait (%p1394_p11), [#allocation4], 32  }
  0x1d   : > { %1237 = vsyncadd (%p1394_p11), [#allocation4], 4294967264 }
  0x1e   : > { %1239 = dma.done.wait (%p1394_p11), [#allocation7], 32  }
  0x1f   : > { %1241 = vsyncadd (%p1394_p11), [#allocation7], 4294967264  ;;  %p462_p0 = scmp.lt.s32.totalorder %s1264_s16, 1  ;;  %v544_v0 = vlaneseq  ;;  %v572_v5 = vld [vmem:[#allocation6] sm:$0x3]  ;;  %v1276_v9 = vmov 1.0  }
  0x20   : > { %v576_v6 = vperm.slane %v572_v5, 0  ;;  %v577_v7 = vperm.slane %v572_v5, 1  ;;  %v553_v8 = vld [vmem:[#allocation3] sm:$0x3]  ;;  %vm499_vm4 = vcmask 1043456   ;;  %v489_v13 = vld [vmem:[%s1509_s3] sm:$0xff] }
  0x21   : > { %s463_s17 = scalar_select %p462_p0, %s1264_s16, 1  ;;  %v545_v1 = vshrl.u32 %v544_v0, 7  ;;  %v554_v11 = vperm.slane %v553_v8, 0  ;;  %v555_v12 = vperm.slane %v553_v8, 1  ;;  %vm495_vm5 = vcmask 31744   ;;  %v650_v16 = vld [vmem:[%s1510_s4] sm:$0xff] }
  0x22   : > { %v1277_v17 = vmov 0   ;;  %vm487_vm10 = vcmask 261120   ;;  %v1278_v20 = vmov 0.0   ;;  %v663_v21 = vld [vmem:[%s1512_s6] sm:$0xf]  ;;  %vm669_vm11 = vcmask 64512  }
  0x23   : > { %s998_s21 = sshll.u32 %s463_s17, 3  ;;  %v548_v2 = vadd.s32 24, %v545_v1  ;;  %v546_v10 = vadd.s32 8, %v545_v1  ;;  %vm582_vm2 = vcmp.eq.s32.totalorder %v576_v6, %v545_v1  ;;  %vm583_vm3 = vcmp.eq.s32.totalorder %v577_v7, %v545_v1  ;;  %1084 = vset.pattern.permute.xlu0 %v1277_v17  ;;  %1085 = vset.pattern.permute.xlu1 %v1277_v17  ;;  %488 = vst.msk [vmem:[#allocation2] sm:$0xff] %vm487_vm10, %v1278_v20  ;;  %v662_v36 = vld [vmem:[%s1511_s5] sm:$0xf] }
  0x24   : > { %s473_s30 = scalar_lea.vmem %s1506_s0, %s998_s21  ;;  %vm556_vm8 = vcmp.eq.s32.totalorder %v554_v11, %v545_v1  ;;  %vm557_vm9 = vcmp.eq.s32.totalorder %v555_v12, %v545_v1  ;;  %653 = vperm.xlu0 %1084, %v650_v16   ;;  %666 = vperm.xlu1 %1085, %v663_v21   ;;  %s1279_s21 = smov 112   ;;  %v715_v37 = vld [vmem:[%s1514_s8] sm:$0xf] }
  0x25   : > { %v979_v3 = vadd.s32 4294967280, %v548_v2  ;;  %v490_v4 = vld [vmem:[%s473_s30] sm:$0xff]  ;;  %vm558_vm6 = vcmp.eq.s32.totalorder %v554_v11, %v546_v10  ;;  %vm559_vm7 = vcmp.eq.s32.totalorder %v555_v12, %v546_v10  ;;  %s1442_s11 = sand.u32 1, %s1256_s14   ;;  %s1520_s12 = sshll.u32 %s1264_s16, 2 }
  0x26   : > { %492 = vst [vmem:[#allocation1] ss:$2 sm:$0xff] %v490_v4  ;;  %v714_v38 = vld [vmem:[%s1513_s7] sm:$0xf]  ;;  %s1519_s20 = sshll.u32 %s1442_s11, 2  ;;  %s784_s19 = scalar_lea.hbm %s1515_s9, %s1520_s12 }
  0x27   : > { %vm584_vm0 = vcmp.eq.s32.totalorder %v576_v6, %v979_v3  ;;  %vm585_vm1 = vcmp.eq.s32.totalorder %v577_v7, %v979_v3  ;;  %s453_s17 = scalar_lea.vmem [#allocation8], %s1519_s20  ;;  %s788_s27 = sshll.u32 %s784_s19, 4  ;;  %s789_s27 = int_to_ptr.hbm [resolvable:$true] %s788_s27 }
  0x28   : > { %980 = vmatpush.xpose.msk.msra.mxu2 %vm584_vm0, %v1276_v9  ;;  %984 = vmatpush.xpose.msk.msra.mxu3 %vm585_vm1, %v1276_v9  ;;  %vm712_vm0 = vcmask 125952   ;;  %s769_s29 = scalar_lea.sflag [#allocation5], %s1442_s11  ;;  %s1168_s30 = sshra.s32 %s789_s27, 4  ;;  %s1169_s30 = int_to_ptr.hbm [resolvable:$true] %s1168_s30 }
  0x29   : > { %s1170_s28 = scalar_lea.hbm %s1169_s30, 4  ;;  %s1174_s19 = scalar_lea.hbm %s1515_s9, 8 }
  0x2a   : > { %v602_v23 = vld [vmem:[#allocation2] sm:$0xff]  ;;  %p1171_p1 = scmp.ne.s32.totalorder %s1169_s30, %s1170_s28  ;;  %p1175_p5 = scmp.lt.s32.totalorder %s1169_s30, %s1515_s9 }
  0x2b   : > { %p1176_p6 = scmp.lt.s32.totalorder %s1174_s19, %s1170_s28 }
  0x2c   : > { %981 = vmatpush.xpose.msk.msra.mxu2 %vm582_vm2, %v1276_v9  ;;  %985 = vmatpush.xpose.msk.msra.mxu3 %vm583_vm3, %v1276_v9  ;;  %p1172_p2 = pnand %p1171_p1, %p1375_p4 }
  0x2d   : > { %v493_v14 = vld.sshfl [vmem:[#allocation1] sm:$0xff pattern:$0x75316420]  ;;  %v494_v15 = vld.sshfl [vmem:[#allocation1 + $0x8] sm:$0xff pattern:$0x75316420]  ;;  %718 = vperm.xlu1 %1085, %v715_v37   ;;  %p1177_p7 = por %p1176_p6, %p1175_p5 }
  0x2e   : > { %973 = vmatpush.msk.msra.mxu0 %vm499_vm4, %v493_v14  ;;  %975 = vmatpush.msk.msra.mxu1 %vm499_vm4, %v494_v15  ;;  %p1173_p3 = pneg %p1172_p2 }
  0x2f   : > { %974 = vmatmul.msk.f32.vlgmr.msra.gmra.mxu0 %vm495_vm5, %v489_v13  ;;  %976 = vmatmul.msk.f32.vlgmr.msra.gmra.mxu1 %vm495_vm5, %v489_v13 }
  0x30   : > { %982 = vmatpush.xpose.msk.msra.mxu2 %vm558_vm6, %v1276_v9  ;;  %986 = vmatpush.xpose.msk.msra.mxu3 %vm559_vm7, %v1276_v9  ;;  %p1178_p9 = pnand %p1177_p7, %p1173_p3 }
  0x34   : > { %983 = vmatpush.xpose.msk.msra.mxu2 %vm556_vm8, %v1276_v9  ;;  %987 = vmatpush.xpose.msk.msra.mxu3 %vm557_vm9, %v1276_v9 }
  0x96   : > { %v654_v27 = vpop.permute.xlu0 %653  ;;  %v667_v40 = vpop.permute.xlu1 %666 }
  0xac   : > { %v521_v18 = vpop.f32.mrf.mxu0  ;;  %v541_v19 = vpop.f32.mrf.mxu1 }
  0xad   : > { %619 = vmatmul.f32.vlgmr.msra.gmra.mxu2 %v521_v18  ;;  %639 = vmatmul.f32.vlgmr.msra.gmra.mxu3 %v541_v19 }
 0x130   : > { %v620_v22 = vpop.f32.mrf.mxu2  ;;  %v640_v24 = vpop.f32.mrf.mxu3 }
 0x131   : > { %v641_v25 = vadd.f32 %v640_v24, %v620_v22 }
 0x133   : > { %v643_v26 = vadd.f32 %v641_v25, %v602_v23 }
 0x135   : > { %645 = vst.msk [vmem:[#allocation2] sm:$0xff] %vm487_vm10, %v643_v26 }
 0x13c   : > { %v648_v28 = vld [vmem:[#allocation2] sm:$0xff] }
 0x13d   : > { %v649_v29 = vmul.f32 0.0625, %v648_v28 }
 0x13f   : > { %v656_v30 = vadd.f32 %v654_v27, %v649_v29 }
 0x141   : > { %v657_v31 = vadd.f32 3.0, %v656_v30 }
 0x143   : > { %v658_v32 = vmax.f32 %v657_v31, 0.0 }
 0x145   : > { %v659_v33 = vmin.f32 %v658_v32, 6.0 }
 0x147   : > { %v660_v34 = vmul.f32 0.16666667, %v659_v33 }
 0x149   : > { %v661_v35 = vmul.f32 %v660_v34, %v656_v30 }
 0x14b   : > { %722 = vrot.lane.b32.xlu0 %v661_v35, %s1279_s21  ;;  %688 = vmatpush.msrb.mxu0 %v661_v35  ;;  %s786_s21 = sshll.u32 %s453_s17, 4  ;;  %s787_s21 = int_to_ptr.vmem [resolvable:$true] %s786_s21 }
 0x14c   : > { %988 = vmatmul.msk.f32.vlgmr.msrb.gmra.mxu0 %vm669_vm11, %v662_v36 }
 0x1bd   : > { %v723_v39 = vpop.permute.xlu0 %722 }
 0x1be   : > { %743 = vmatpush.msrb.mxu1 %v723_v39 }
 0x1bf   : > { %990 = vmatmul.msk.f32.vlgmr.msrb.gmra.mxu1 %vm669_vm11, %v714_v38 }
 0x1c9   : > { %v690_v41 = vpop.f32.mrf.mxu0 }
 0x1ca   : > { %v691_v42 = vadd.f32 %v690_v41, %v667_v40 }
 0x1cc   : > { %v989_v43 = vmul.f32 -1.442695, %v691_v42 }
 0x1ce   : > { %1086 = vpow2.f32 %v989_v43 }
 0x1d4   : > { %v1087_v44 = vpop.eup %1086 }
 0x1d5   : > { %v696_v45 = vadd.f32 1.0, %v1087_v44 }
 0x1d7   : > { %1088 = vrcp.f32 %v696_v45  ;;  %v708_v50 = vand.u32 2147483648, %v696_v45  ;;  %vm702_vm12 = vweird.f32 %v696_v45  ;;  %v706_v52 = vand.u32 2147483647, %v696_v45 }
 0x1d9   : > { %v709_v53 = vor.u32 1.1754944e-38, %v708_v50  ;;  %vm707_vm15 = vcmp.eq.f32.partialorder %v706_v52, 8.507059e+37 }
 0x1dd   : > { %v1089_v46 = vpop.eup %1088 }
 0x1de   : > { %v698_v47 = vmul.f32 %v1089_v46, %v696_v45  ;;  %vm703_vm13 = vweird.f32 %v1089_v46 }
 0x1df   : > { %vm704_vm14 = vmor %vm702_vm12, %vm703_vm13 }
 0x1e0   : > { %v699_v48 = vsub.f32 1.0, %v698_v47 }
 0x1e2   : > { %v700_v49 = vmul.f32 %v1089_v46, %v699_v48 }
 0x1e4   : > { %v701_v51 = vadd.f32 %v1089_v46, %v700_v49 }
 0x1e6   : > { %v705_v54 = vsel %vm704_vm14, %v1089_v46, %v701_v51 }
 0x1e7   : > { %v710_v55 = vsel %vm707_vm15, %v709_v53, %v705_v54 }
 0x1e8   : > { %713 = vst.msk [vmem:[%s453_s17] sm:$0xf] %vm712_vm0, %v710_v55 }
 0x1e9   : > { %1181 = shalt.err (!%p1178_p9)
}
 0x1ea   : > { %1007 = dma.vmem_to_hbm [thread:$0]  (%p1375_p4), %s787_s21, 64, %s789_s27, %s769_s29   ;;  %v719_v56 = vpop.permute.xlu1 %718 }
 0x1eb   : > { %s1527_s12 = sshll.u32 %s1264_s16, 2  ;;  %s1528_s21 = sshll.u32 %s1442_s11, 2 }
 0x1ec   : > { %s798_s30 = scalar_lea.hbm %s1516_s10, %s1527_s12  ;;  %s460_s27 = scalar_lea.vmem [#allocation9], %s1528_s21 }
 0x1ed   : > { %s800_s29 = sshll.u32 %s460_s27, 4  ;;  %s802_s28 = sshll.u32 %s798_s30, 4  ;;  %s801_s29 = int_to_ptr.vmem [resolvable:$true] %s800_s29  ;;  %s803_s28 = int_to_ptr.hbm [resolvable:$true] %s802_s28 }
 0x1ee   : > { %s774_s16 = scalar_lea.sflag [#allocation10], %s1442_s11  ;;  %s1196_s22 = sshra.s32 %s803_s28, 4  ;;  %s1197_s22 = int_to_ptr.hbm [resolvable:$true] %s1196_s22 }
 0x1ef   : > { %s1198_s24 = scalar_lea.hbm %s1197_s22, 4  ;;  %s1202_s20 = scalar_lea.hbm %s1516_s10, 8 }
 0x1f0   : > { %p1199_p10 = scmp.ne.s32.totalorder %s1197_s22, %s1198_s24  ;;  %p1203_p13 = scmp.lt.s32.totalorder %s1197_s22, %s1516_s10 }
 0x1f1   : > { %p1204_p0 = scmp.lt.s32.totalorder %s1202_s20, %s1198_s24 }
 0x1f2   : > { %p1200_p11 = pnand %p1199_p10, %p1375_p4 }
 0x1f3   : > { %p1205_p1 = por %p1204_p0, %p1203_p13 }
 0x1f4   : > { %p1201_p12 = pneg %p1200_p11 }
 0x1f6   : > { %p1206_p2 = pnand %p1205_p1, %p1201_p12 }
 0x23c   : > { %v745_v57 = vpop.f32.mrf.mxu1 }
 0x23d   : > { %v746_v58 = vadd.f32 %v745_v57, %v719_v56 }
 0x23f   : > { %v991_v59 = vmul.f32 -1.442695, %v746_v58 }
 0x241   : > { %1090 = vpow2.f32 %v991_v59 }
 0x247   : > { %v1091_v60 = vpop.eup %1090 }
 0x248   : > { %v751_v61 = vadd.f32 1.0, %v1091_v60 }
 0x24a   : > { %1092 = vrcp.f32 %v751_v61  ;;  %v763_v1 = vand.u32 2147483648, %v751_v61  ;;  %v761_v3 = vand.u32 2147483647, %v751_v61  ;;  %vm757_vm2 = vweird.f32 %v751_v61 }
 0x24c   : > { %v764_v5 = vor.u32 1.1754944e-38, %v763_v1  ;;  %vm762_vm4 = vcmp.eq.f32.partialorder %v761_v3, 8.507059e+37 }
 0x250   : > { %v1093_v62 = vpop.eup %1092 }
 0x251   : > { %v753_v63 = vmul.f32 %v1093_v62, %v751_v61  ;;  %vm758_vm1 = vweird.f32 %v1093_v62 }
 0x252   : > { %vm759_vm3 = vmor %vm757_vm2, %vm758_vm1 }
 0x253   : > { %v754_v0 = vsub.f32 1.0, %v753_v63 }
 0x255   : > { %v755_v2 = vmul.f32 %v1093_v62, %v754_v0 }
 0x257   : > { %v756_v4 = vadd.f32 %v1093_v62, %v755_v2 }
 0x259   : > { %v760_v6 = vsel %vm759_vm3, %v1093_v62, %v756_v4 }
 0x25a   : > { %v765_v7 = vsel %vm762_vm4, %v764_v5, %v760_v6 }
 0x25b   : > { %767 = vst.msk [vmem:[%s460_s27] sm:$0xf] %vm712_vm0, %v765_v7 }
 0x25c   : > { %1209 = shalt.err (!%p1206_p2)
}
 0x25d   : > { %1008 = dma.vmem_to_hbm [thread:$0]  (%p1375_p4), %s801_s29, 64, %s803_s28, %s774_s16  }
 0x25e PF: > { %p1029_p3 = scmp.ge.s32.totalorder %s1272_s18, 2  ;;  %s814_s11 = sand.u32 1, %s1252_s13  }
 0x25f   : > { %s815_s21 = scalar_lea.sflag [#allocation5], %s814_s11 }
 0x260   : > { %p1019_p5 = pnand %p1029_p3, %p1382_p8 }
 0x262   : > { %p1020_p6 = pneg %p1019_p5 }
 0x264   : > { %1243 = dma.done.wait (%p1020_p6), %s815_s21, 64  }
 0x265   : > { %1245 = vsyncadd (%p1020_p6), %s815_s21, 4294967232  ;;  %s825_s27 = scalar_lea.sflag [#allocation10], %s814_s11 }
 0x266   : > { %1247 = dma.done.wait (%p1020_p6), %s825_s27, 64  }
 0x267   : > { %1249 = vsyncadd (%p1020_p6), %s825_s27, 4294967232  ;;  %s29_s18 = sadd.s32 1, %s1272_s18   ;;  %s1529_s16 = sld [smem:[#allocation15_spill]] }
 0x268   : > { %p26_p7 = scmp.ge.s32.totalorder %s29_s18, 4   ;;  %s1530_s17 = sld [smem:[#allocation16_spill]] }
 0x269   : > { %s1531_s13 = smov %s1256_s14  ;;  %s1532_s14 = smov %s1260_s15 }
 0x26a   : > { %s1533_s15 = smov %s1388_s26  ;;  %28 = sbr.rel (!%p26_p7) target bundleno = 8 (0x8), region = 130 }
 0x26f   :  { %831 = vsyncpa [#allocation4], 1 }
 0x270   :  { %833 = vsyncpa [#allocation4 + $0x1], 1 }
 0x271   :  { %834 = vsyncpa [#allocation7], 1 }
 0x272   :  { %835 = vsyncpa [#allocation5], 1 }
 0x273   :  { %837 = vsyncpa [#allocation5 + $0x1], 1 }
 0x274   :  { %838 = vsyncpa [#allocation10], 1 }
 0x275   :  { %840 = vsyncpa [#allocation10 + $0x1], 1 }

</bundles_post_ra>
